<compile_context>
chip_gen: v7x
topology: tpu7x:2x2x1
jax: 0.10.0
libtpu: 0.0.40
codegen_flags: <defaults>
</compile_context>

<pallas_src>
import functools

import numpy as np
import jax
import jax.numpy as jnp
from jax import lax
from jax.experimental import pallas as pl
from jax.experimental.pallas import tpu as pltpu


# ---------------------------------------------------------------------------
# Pallas kernel: stride-1 VALID conv on pre-padded, halo'd rows + LeakyReLU(0.1)
# ---------------------------------------------------------------------------
def _make_conv_kernel(kh, tile_h):
    def kernel(x_ref, band_ref, o_ref):
        # x_ref:    (1, tile_h + kh - 1, Wp*Cin)   bf16  halo'd, lane-folded input rows
        # band_ref: (kh, Wp*Cin, Wo*Cout)          bf16  banded (Toeplitz) conv weight
        # o_ref:    (1, tile_h, Wo*Cout)           f32   lane-dense output rows
        acc = jnp.dot(x_ref[0, 0:tile_h, :], band_ref[0],
                      preferred_element_type=jnp.float32)
        for dy in range(1, kh):                    # static unroll, kh is tiny
            acc += jnp.dot(x_ref[0, dy:dy + tile_h, :], band_ref[dy],
                           preferred_element_type=jnp.float32)
        # norm2d = Identity ; activate = LeakyReLU(negative_slope=0.1), in f32
        o_ref[0] = jnp.where(acc > 0, acc, 0.1 * acc).astype(o_ref.dtype)

    return kernel


def _band_weight(weight_oihw, wp):
    """(Cout, Cin, kh, kw) -> banded (kh, Wp*Cin, Wo*Cout) bf16.

    band[dy, wpos*Cin + ci, w*Cout + co] = W[co, ci, dy, wpos - w] if 0 <= wpos-w < kw
    so that  x_row[Wp*Cin] @ band[dy]  merges all dx taps and channels into one matmul.
    """
    cout, cin, kh, kw = weight_oihw.shape
    wo = wp - kw + 1
    w_hwio = jnp.transpose(weight_oihw, (2, 3, 1, 0))          # (kh, kw, cin, cout)
    dx = jnp.arange(wp)[:, None] - jnp.arange(wo)[None, :]     # (wp, wo)
    valid = (dx >= 0) & (dx < kw)
    band = w_hwio[:, jnp.clip(dx, 0, kw - 1)]                  # (kh, wp, wo, cin, cout)
    band = jnp.where(valid[None, :, :, None, None], band, 0.0)
    band = jnp.transpose(band, (0, 1, 3, 2, 4))                # (kh, wp, cin, wo, cout)
    return band.reshape(kh, wp * cin, wo * cout).astype(jnp.bfloat16)


def _pick_tile_h(ho, wp_cin, wo_cout, kh, budget_bytes=12 << 20):
    """Largest multiple-of-8 divisor of Ho whose (double-buffered) blocks fit budget."""
    if ho % 8 != 0:
        return ho                                  # block == full dim fallback
    band_bytes = 2 * kh * wp_cin * wo_cout * 2     # double-buffered bf16 band
    tile_h = 8
    for t in range(8, ho + 1, 8):
        blk = 2 * ((t + kh - 1) * wp_cin * 2 + t * wo_cout * 4)
        if ho % t == 0 and blk + band_bytes <= budget_bytes:
            tile_h = t
    return tile_h


def conv_leakyrelu_pallas(x_pad_bf16, weight_oihw, *, tile_h=None):
    """Conv2d(k, stride=1, bias=False) on a pre-padded NHWC bf16 input + LeakyReLU(0.1).
    Returns (N, Ho, Wo, Cout) float32."""
    n, hp, wp, cin = x_pad_bf16.shape
    cout, cin_w, kh, kw = weight_oihw.shape
    assert cin == cin_w, (cin, cin_w)
    ho, wo = hp - kh + 1, wp - kw + 1

    if tile_h is None:
        tile_h = _pick_tile_h(ho, wp * cin, wo * cout, kh)
    assert ho % tile_h == 0 and (tile_h % 8 == 0 or tile_h == ho), (ho, tile_h)
    n_tiles = ho // tile_h

    # Lane-fold W and C (free HBM view), then gather (kh-1)-row halo'd windows
    # per H tile (duplicates only (kh-1)/tile_h of the rows).
    x_fold = x_pad_bf16.reshape(n, hp, wp * cin)
    rows = (jnp.arange(n_tiles)[:, None] * tile_h
            + jnp.arange(tile_h + kh - 1)[None, :])             # (n_tiles, tile_h+kh-1)
    x_halo = x_fold[:, rows].reshape(n * n_tiles, tile_h + kh - 1, wp * cin)

    band = _band_weight(weight_oihw, wp)                        # (kh, Wp*Cin, Wo*Cout)

    y_flat = pl.pallas_call(
        _make_conv_kernel(kh, tile_h),
        out_shape=jax.ShapeDtypeStruct((n, ho, wo * cout), jnp.float32),
        grid=(n, n_tiles),
        in_specs=[
            pl.BlockSpec((1, tile_h + kh - 1, wp * cin),
                         lambda b, t: (b * n_tiles + t, 0, 0)),
            pl.BlockSpec((kh, wp * cin, wo * cout), lambda b, t: (0, 0, 0)),
        ],
        out_specs=pl.BlockSpec((1, tile_h, wo * cout), lambda b, t: (b, t, 0)),
        compiler_params=pltpu.CompilerParams(
            dimension_semantics=("parallel", "parallel"),
            vmem_limit_bytes=32 * 1024 * 1024),
    )(x_halo, band)

    return y_flat.reshape(n, ho, wo, cout)


# ---------------------------------------------------------------------------
# XLA glue: bilinear x2 upsample (align_corners=True) == nn.UpsamplingBilinear2d
# ---------------------------------------------------------------------------
def upsample_bilinear_x2_align_corners(x_nhwc):
    _, h, w, _ = x_nhwc.shape
    ho, wo = 2 * h, 2 * w

    def coords(n_in, n_out):
        if n_out > 1 and n_in > 1:
            src = jnp.arange(n_out, dtype=jnp.float32) * (n_in - 1) / (n_out - 1)
        else:
            src = jnp.zeros((n_out,), jnp.float32)
        i0 = jnp.clip(jnp.floor(src).astype(jnp.int32), 0, n_in - 1)
        i1 = jnp.clip(i0 + 1, 0, n_in - 1)
        return i0, i1, src - i0.astype(jnp.float32)

    h0, h1, fh = coords(h, ho)
    w0, w1, fw = coords(w, wo)
    xh = (x_nhwc[:, h0] * (1.0 - fh)[None, :, None, None]
          + x_nhwc[:, h1] * fh[None, :, None, None])
    return (xh[:, :, w0] * (1.0 - fw)[None, None, :, None]
            + xh[:, :, w1] * fw[None, None, :, None])


@functools.partial(jax.jit, static_argnames=("tile_h",))
def deconv_forward(x_nchw, skip_nchw, weight_oihw, *, tile_h=None):
    """deconv.forward(x, skip): upsample x2 -> replication pad -> conv+LeakyReLU
    (Pallas) -> cat([y, skip], dim=1).  NCHW in / NCHW out, like the module."""
    _, _, kh, kw = weight_oihw.shape
    ph, pw = (kh - 1) // 2, (kw - 1) // 2

    # NHWC before upsampling so no transpose ever touches the 4x-larger tensor;
    # upsample + pad + bf16 cast + halo gather fuse into one XLA pass under jit.
    # TODO(synk): fuse the bilinear x2 upsample + replication pad into the Pallas
    # kernel itself (interpolate rows on the fly from the pre-upsample tile) to
    # cut the kernel's HBM read traffic ~4x.
    x_nhwc = jnp.transpose(x_nchw, (0, 2, 3, 1))
    x_up = upsample_bilinear_x2_align_corners(x_nhwc)                        # f32
    x_pad = jnp.pad(x_up, ((0, 0), (ph, ph), (pw, pw), (0, 0)), mode="edge")

    y_nhwc = conv_leakyrelu_pallas(x_pad.astype(jnp.bfloat16), weight_oihw,
                                   tile_h=tile_h)

    # torch.cat([y, skip], dim=1): fused by XLA with the single mandatory NCHW
    # transpose pass (routing skip through the kernel would only add HBM traffic
    # since the module's NCHW return forces this transpose anyway).
    y_nchw = jnp.transpose(y_nhwc, (0, 3, 1, 2))
    return jnp.concatenate([y_nchw, skip_nchw], axis=1)


if __name__ == "__main__":
    key = jax.random.PRNGKey(0)
    k_x, k_s, k_w = jax.random.split(key, 3)

    N, in_c, out_c, skip_c = 2, 4, 8, 4
    H = W = 16
    kh = kw = 3

    x = jax.random.normal(k_x, (N, in_c, H, W), jnp.float32)
    skip = jax.random.normal(k_s, (N, skip_c, 2 * H, 2 * W), jnp.float32)
    # Conv2d weight, PyTorch layout (out_c, in_c, kh, kw); deterministic init.
    weight = jax.random.normal(k_w, (out_c, in_c, kh, kw), jnp.float32) * 0.1

    out = deconv_forward(x, skip, weight, tile_h=8)
    out = jax.block_until_ready(out)
    assert out.shape == (N, out_c + skip_c, 2 * H, 2 * W), out.shape

    # --- tight check: Pallas conv + LeakyReLU vs lax reference on identical
    #     bf16-rounded operands ------------------------------------------------
    ph, pw = (kh - 1) // 2, (kw - 1) // 2
    x_up = upsample_bilinear_x2_align_corners(jnp.transpose(x, (0, 2, 3, 1)))
    x_pad_bf16 = jnp.pad(x_up, ((0, 0), (ph, ph), (pw, pw), (0, 0)),
                         mode="edge").astype(jnp.bfloat16)
    y_pl = conv_leakyrelu_pallas(x_pad_bf16, weight, tile_h=8)

    w_hwio = (jnp.transpose(weight, (2, 3, 1, 0))
              .astype(jnp.bfloat16).astype(jnp.float32))
    y_ref = lax.conv_general_dilated(
        x_pad_bf16.astype(jnp.float32), w_hwio, window_strides=(1, 1),
        padding="VALID", dimension_numbers=("NHWC", "HWIO", "NHWC"),
        precision=lax.Precision.HIGHEST)
    y_ref = jnp.where(y_ref > 0, y_ref, 0.1 * y_ref)
    np.testing.assert_allclose(np.asarray(y_pl), np.asarray(y_ref),
                               rtol=1e-4, atol=1e-4)

    # --- loose end-to-end check (bf16 rounding of the conv input dominates) ----
    ref_full = jnp.concatenate([jnp.transpose(y_ref, (0, 3, 1, 2)), skip], axis=1)
    np.testing.assert_allclose(np.asarray(out), np.asarray(ref_full),
                               rtol=2e-2, atol=2e-2)

    print("KERNEL_OK")
</pallas_src>

<mosaic_0001>
module attributes {stable_mosaic.version = 11 : i64} {
  func.func @kernel(%arg0: i32, %arg1: i32, %arg2: memref<1x10x136xbf16, #tpu.memory_space<vmem>>, %arg3: memref<3x136x256xbf16, #tpu.memory_space<vmem>>, %arg4: memref<1x8x256xf32, #tpu.memory_space<vmem>>) attributes {dimension_semantics = [#tpu.dimension_semantics<parallel>, #tpu.dimension_semantics<parallel>], iteration_bounds = array<i64: 2, 4>, scalar_prefetch = 0 : i64, scratch_operands = 0 : i64, tpu.core_type = #tpu.core_type<tc>, window_params = [{transform_indices = @transform_0, window_bounds = array<i64: 1, 10, 136>}, {pipeline_mode = #tpu.pipeline_mode<synchronous>, transform_indices = @transform_1, window_bounds = array<i64: 3, 136, 256>}, {transform_indices = @transform_2, window_bounds = array<i64: 1, 8, 256>}]} {
    %c0 = arith.constant 0 : index
    %c0_0 = arith.constant 0 : index
    %c0_1 = arith.constant 0 : index
    %0 = vector.load %arg2[%c0, %c0_0, %c0_1] : memref<1x10x136xbf16, #tpu.memory_space<vmem>>, vector<1x8x136xbf16>
    %1 = vector.shape_cast %0 : vector<1x8x136xbf16> to vector<8x136xbf16>
    %c0_2 = arith.constant 0 : index
    %c0_3 = arith.constant 0 : index
    %c0_4 = arith.constant 0 : index
    %2 = vector.load %arg3[%c0_2, %c0_3, %c0_4] : memref<3x136x256xbf16, #tpu.memory_space<vmem>>, vector<1x136x256xbf16>
    %3 = vector.shape_cast %2 : vector<1x136x256xbf16> to vector<136x256xbf16>
    %cst = arith.constant dense<0.000000e+00> : vector<8x256xf32>
    %4 = tpu.matmul %1, %3, %cst {dimension_numbers = #tpu.dot_dimension_numbers<[1], [0], [0], [1], [0, 0, 1, 1], [], []>} : vector<8x136xbf16>, vector<136x256xbf16>, vector<8x256xf32> -> vector<8x256xf32>
    %c0_5 = arith.constant 0 : index
    %c1 = arith.constant 1 : index
    %c0_6 = arith.constant 0 : index
    %5 = vector.load %arg2[%c0_5, %c1, %c0_6] : memref<1x10x136xbf16, #tpu.memory_space<vmem>>, vector<1x8x136xbf16>
    %6 = vector.shape_cast %5 : vector<1x8x136xbf16> to vector<8x136xbf16>
    %c1_7 = arith.constant 1 : index
    %c0_8 = arith.constant 0 : index
    %c0_9 = arith.constant 0 : index
    %7 = vector.load %arg3[%c1_7, %c0_8, %c0_9] : memref<3x136x256xbf16, #tpu.memory_space<vmem>>, vector<1x136x256xbf16>
    %8 = vector.shape_cast %7 : vector<1x136x256xbf16> to vector<136x256xbf16>
    %cst_10 = arith.constant dense<0.000000e+00> : vector<8x256xf32>
    %9 = tpu.matmul %6, %8, %cst_10 {dimension_numbers = #tpu.dot_dimension_numbers<[1], [0], [0], [1], [0, 0, 1, 1], [], []>} : vector<8x136xbf16>, vector<136x256xbf16>, vector<8x256xf32> -> vector<8x256xf32>
    %10 = arith.addf %4, %9 : vector<8x256xf32>
    %c0_11 = arith.constant 0 : index
    %c2 = arith.constant 2 : index
    %c0_12 = arith.constant 0 : index
    %11 = vector.load %arg2[%c0_11, %c2, %c0_12] : memref<1x10x136xbf16, #tpu.memory_space<vmem>>, vector<1x8x136xbf16>
    %12 = vector.shape_cast %11 : vector<1x8x136xbf16> to vector<8x136xbf16>
    %c2_13 = arith.constant 2 : index
    %c0_14 = arith.constant 0 : index
    %c0_15 = arith.constant 0 : index
    %13 = vector.load %arg3[%c2_13, %c0_14, %c0_15] : memref<3x136x256xbf16, #tpu.memory_space<vmem>>, vector<1x136x256xbf16>
    %14 = vector.shape_cast %13 : vector<1x136x256xbf16> to vector<136x256xbf16>
    %cst_16 = arith.constant dense<0.000000e+00> : vector<8x256xf32>
    %15 = tpu.matmul %12, %14, %cst_16 {dimension_numbers = #tpu.dot_dimension_numbers<[1], [0], [0], [1], [0, 0, 1, 1], [], []>} : vector<8x136xbf16>, vector<136x256xbf16>, vector<8x256xf32> -> vector<8x256xf32>
    %16 = arith.addf %10, %15 : vector<8x256xf32>
    %cst_17 = arith.constant 0.000000e+00 : f32
    %17 = vector.broadcast %cst_17 : f32 to vector<8x256xf32>
    %18 = arith.cmpf ogt, %16, %17 : vector<8x256xf32>
    %cst_18 = arith.constant 1.000000e-01 : f32
    %19 = vector.broadcast %cst_18 : f32 to vector<8x256xf32>
    %20 = arith.mulf %19, %16 : vector<8x256xf32>
    %21 = arith.select %18, %16, %20 : vector<8x256xi1>, vector<8x256xf32>
    %c0_19 = arith.constant 0 : index
    %c0_20 = arith.constant 0 : index
    %c0_21 = arith.constant 0 : index
    %22 = vector.load %arg4[%c0_19, %c0_20, %c0_21] : memref<1x8x256xf32, #tpu.memory_space<vmem>>, vector<1x8x256xf32>
    %23 = vector.shape_cast %22 : vector<1x8x256xf32> to vector<8x256xf32>
    %24 = vector.shape_cast %21 : vector<8x256xf32> to vector<1x8x256xf32>
    tpu.vector_store %arg4[%c0_19, %c0_20, %c0_21], %24 {strides = array<i32>} : memref<1x8x256xf32, #tpu.memory_space<vmem>>, vector<1x8x256xf32>,
    return
  }
  func.func @transform_0(%arg0: i32, %arg1: i32) -> (i32, i32, i32) {
    %c4_i32 = arith.constant 4 : i32
    %0 = arith.muli %arg0, %c4_i32 : i32
    %1 = arith.addi %0, %arg1 : i32
    %c0_i32 = arith.constant 0 : i32
    %c0_i32_0 = arith.constant 0 : i32
    %c0_i32_1 = arith.constant 0 : i32
    return %1, %c0_i32, %c0_i32_0 : i32, i32, i32
  }
  func.func @transform_1(%arg0: i32, %arg1: i32) -> (i32, i32, i32) {
    %c0_i32 = arith.constant 0 : i32
    %c0_i32_0 = arith.constant 0 : i32
    %c0_i32_1 = arith.constant 0 : i32
    %c0_i32_2 = arith.constant 0 : i32
    return %c0_i32, %c0_i32_0, %c0_i32_1 : i32, i32, i32
  }
  func.func @transform_2(%arg0: i32, %arg1: i32) -> (i32, i32, i32) {
    %c0_i32 = arith.constant 0 : i32
    %c0_i32_0 = arith.constant 0 : i32
    return %arg0, %arg1, %c0_i32 : i32, i32, i32
  }
}

</mosaic_0001>

<bundles_post_ra>
// kernel: deconv_forward.1
= control target key start
LH: loop header
LB: loop body
LE: loop exit
PB: predicated region body
PF: predicated region fallthrough
CT: control target
= control target key end

     0   :  { %s1075_s9 = smov 0   ;;  %s1077_s10 = smov 0   ;;  %s1321_s0 = inlined_call_operand.vmem [shape: bf16[8,10,136], index: 0, kind: input, shape index: {}]   ;;  %s1322_s1 = inlined_call_operand.vmem [shape: bf16[3,136,256], index: 1, kind: input, shape index: {}]   ;;  %s1323_s2 = inlined_call_operand.vmem [shape: f32[2,32,256], index: 2, kind: output, shape index: {}]  }
   0x1   :  { %s1079_s11 = smov 0   ;;  %s1081_s12 = smov 0  }
   0x2   :  { %s1083_s13 = smov 0  }
   0x3 LB: > { %s21_s14 = sadd.s32 1, %s1050_s11  ;;  %s24_s15 = sadd.s32 1, %s1054_s12  ;;  %s1058_s13 = sphi %s1083_s13, %s12_s13   ;;  %s1054_s12 = sphi %s1081_s12, %s1327_s12   ;;  %s1050_s11 = sphi %s1079_s11, %s1326_s11   ;;  %s1046_s10 = sphi %s1077_s10, %s1325_s10   ;;  %s1042_s9 = sphi %s1075_s9, %s1324_s9  }
   0x4   : > { %p22_p0 = scmp.ge.s32.totalorder %s21_s14, 4  ;;  %p780_p1 = scmp.ge.s32.totalorder %s1058_s13, 1 }
   0x5   : > { %p134_p2 = scmp.lt.s32.totalorder %s1058_s13, 9 }
   0x6   : > { %s1329_s14 = smov (%p22_p0, %s21_s14), 0  ;;  %s1331_s15 = smov (!%p22_p0, %s24_s15), %s1054_s12 }
   0x7   : > { %p135_p3 = pnand %p780_p1, %p134_p2  ;;  %p26_p4 = scmp.ge.s32.totalorder %s1331_s15, 2 }
   0x8   : > { %v936_v0 = vld [vmem:[%s1322_s1 + $0x4] ss:$8 sps:$4 sm:$0xff] (!%p135_p3)   ;;  %s781_s18 = sshll.u32 (!%p135_p3), %s1046_s10, 2  ;;  %v938_v1 = vld [vmem:[%s1322_s1] ss:$8 sps:$4 sm:$0xff] (!%p135_p3)   ;;  %vm326_vm0 = vcmask (!%p135_p3), 64512  }
   0x9   : > { %s1333_s15 = smov (%p26_p4, %s1331_s15), 0  ;;  %138 = sbr.rel (%p135_p3) target bundleno = 301 (0x12d), region = 28 }
   0xa   : > { %s163_s21 = sadd.s32 (!%p135_p3), %s1042_s9, %s781_s18  ;;  %475 = vmatprep.subr.bf16.mxu0 (!%p135_p3), %v936_v0  ;;  %v939_v2 = vld [vmem:[%s1322_s1 + $0x14] ss:$8 sps:$4 sm:$0xff] (!%p135_p3)   ;;  %v941_v3 = vld [vmem:[%s1322_s1 + $0x10] ss:$8 sps:$4 sm:$0xff] (!%p135_p3)   ;;  %v942_v4 = vld [vmem:[%s1322_s1 + $0x24] ss:$8 sps:$4 sm:$0xff] (!%p135_p3)  }
   0xb   : > { %p164_p5 = scmp.lt.s32.totalorder (!%p135_p3), %s163_s21, 7  ;;  %476 = vmatpush1.bf16.msra.mxu0 (!%p135_p3), %v938_v1  ;;  %v944_v5 = vld [vmem:[%s1322_s1 + $0x20] ss:$8 sps:$4 sm:$0xff] (!%p135_p3)   ;;  %v945_v6 = vld [vmem:[%s1322_s1 + $0x34] ss:$8 sps:$4 sm:$0xff] (!%p135_p3)   ;;  %vm330_vm1 = vcmask (!%p135_p3), 1043456  }
   0xc   : > { %477 = vmatprep.subr.bf16.mxu0 (!%p135_p3), %v939_v2  ;;  %v947_v7 = vld [vmem:[%s1322_s1 + $0x30] ss:$8 sps:$4 sm:$0xff] (!%p135_p3)   ;;  %v948_v8 = vld [vmem:[%s1322_s1 + $0x44] ss:$8 sps:$4 sm:$0xff] (!%p135_p3)   ;;  %v950_v12 = vld [vmem:[%s1322_s1 + $0x40] ss:$8 sps:$4 sm:$0xff] (!%p135_p3)  }
   0xd   : > { %v961_v9 = vld [vmem:[%s1322_s1 + $0x8c] ss:$8 sps:$4 sm:$0xff] (!%p135_p3)   ;;  %v964_v10 = vld [vmem:[%s1322_s1 + $0x88] ss:$8 sps:$4 sm:$0xff] (!%p135_p3)   ;;  %v969_v14 = vld [vmem:[%s1322_s1 + $0x9c] ss:$8 sps:$4 sm:$0xff] (!%p135_p3)  }
   0xe   : > { %337 = vmatprep.subr.bf16.mxu1 (!%p135_p3), %v961_v9  ;;  %v972_v15 = vld [vmem:[%s1322_s1 + $0x98] ss:$8 sps:$4 sm:$0xff] (!%p135_p3)   ;;  %v951_v16 = vld [vmem:[%s1322_s1 + $0x54] ss:$8 sps:$4 sm:$0xff] (!%p135_p3)   ;;  %v978_v18 = vld [vmem:[%s1322_s1 + $0xa8] ss:$8 sps:$4 sm:$0xff] (!%p135_p3)  }
   0xf   : > { %478 = vmatpush1.bf16.msra.mxu0 (!%p135_p3), %v941_v3  ;;  %338 = vmatpush1.bf16.msra.mxu1 (!%p135_p3), %v964_v10  ;;  %v976_v17 = vld [vmem:[%s1322_s1 + $0xac] ss:$8 sps:$4 sm:$0xff] (!%p135_p3)   ;;  %v953_v19 = vld [vmem:[%s1322_s1 + $0x50] ss:$8 sps:$4 sm:$0xff] (!%p135_p3)   ;;  %v982_v21 = vld [vmem:[%s1322_s1 + $0xbc] ss:$8 sps:$4 sm:$0xff] (!%p135_p3)  }
  0x10   : > { %s1335_s21 = smov (!%p164_p5, %s163_s21), 7  ;;  %479 = vmatprep.subr.bf16.mxu0 %v942_v4  ;;  %339 = vmatprep.subr.bf16.mxu1 %v969_v14  ;;  %v954_v20 = vld [vmem:[%s1322_s1 + $0x64] ss:$8 sps:$4 sm:$0xff]   ;;  %v956_v22 = vld [vmem:[%s1322_s1 + $0x60] ss:$8 sps:$4 sm:$0xff]   ;;  %p171_p6 = scmp.lt.s32.totalorder %s1046_s10, 1 }
  0x11   : > { %s889_s28 = sshll.u32 %s1335_s21, 4  ;;  %v984_v23 = vld [vmem:[%s1322_s1 + $0xb8] ss:$8 sps:$4 sm:$0xff]   ;;  %v988_v24 = vld [vmem:[%s1322_s1 + $0xcc] ss:$8 sps:$4 sm:$0xff]   ;;  %p173_p7 = scmp.lt.s32.totalorder %s1042_s9, 3 }
  0x12   : > { %s1135_s7 = scalar_lea.vmem %s1321_s0, %s889_s28  ;;  %v957_v25 = vld [vmem:[%s1322_s1 + $0x74] ss:$8 sps:$4 sm:$0xff]   ;;  %v959_v26 = vld [vmem:[%s1322_s1 + $0x70] ss:$8 sps:$4 sm:$0xff]   ;;  %v198_v27 = vld [vmem:[%s1322_s1 + $0x80] sm:$0xff]  ;;  %s1337_s10 = smov (!%p171_p6, %s1046_s10), 1 }
  0x13   : > { %480 = vmatpush1.bf16.msra.mxu0 %v944_v5  ;;  %v1150_v11 = vld [vmem:[%s1135_s7] sm:$0xff]  ;;  %340 = vmatpush1.bf16.msra.mxu1 %v972_v15  ;;  %v990_v28 = vld [vmem:[%s1322_s1 + $0xc8] ss:$8 sps:$4 sm:$0xff]   ;;  %v845_v30 = vcombine.high %v198_v27, %v198_v27  ;;  %v844_v31 = vcombine.low %v198_v27, %v198_v27  ;;  %v1000_v33 = vld [vmem:[%s1322_s1 + $0xec] ss:$8 sps:$4 sm:$0xff]   ;;  %s1339_s9 = smov (!%p173_p7, %s1042_s9), 3 }
  0x14   : > { %481 = vmatprep.subr.bf16.mxu0 %v945_v6  ;;  %v827_v13 = vcombine.high %v1150_v11, %v1150_v11  ;;  %341 = vmatprep.subr.bf16.mxu1 %v976_v17  ;;  %v994_v29 = vld [vmem:[%s1322_s1 + $0xdc] ss:$8 sps:$4 sm:$0xff]   ;;  %v996_v32 = vld [vmem:[%s1322_s1 + $0xd8] ss:$8 sps:$4 sm:$0xff]   ;;  %v1218_v36 = vld [vmem:[%s1135_s7 + $0x8] sm:$0x11]  ;;  %v826_v38 = vcombine.low %v1150_v11, %v1150_v11 }
  0x15   : > { %v470_v34 = vsel %vm330_vm1, %v844_v31, 0  ;;  %v968_v35 = vld [vmem:[%s1322_s1 + $0x114] ss:$8 sps:$4 sm:$0xff]   ;;  %v1221_v37 = vld [vmem:[%s1135_s7] sm:$0xee]  ;;  %v805_v40 = vcombine.high %v1150_v11, %v1218_v36  ;;  %v804_v41 = vcombine.low %v1150_v11, %v1218_v36  ;;  %v803_v46 = vld [vmem:[%s1322_s1 + $0x108] sm:$0xff] }
  0x16   : > { %847 = vmatprep.mubr.msk.bf16.mxu0 %vm326_vm0, %v827_v13  ;;  %v1002_v39 = vld [vmem:[%s1322_s1 + $0xe8] ss:$8 sps:$4 sm:$0xff]   ;;  %v1006_v43 = vld [vmem:[%s1322_s1 + $0xfc] ss:$8 sps:$4 sm:$0xff]   ;;  %v866_v44 = vcombine.high %v1221_v37, %v1218_v36  ;;  %v1008_v51 = vld [vmem:[%s1322_s1 + $0xf8] ss:$8 sps:$4 sm:$0xff]   ;;  %v823_v54 = vcombine.high %v803_v46, %v803_v46  ;;  %v822_v55 = vcombine.low %v803_v46, %v803_v46 }
  0x17   : > { %482 = vmatpush1.bf16.msra.mxu0 %v947_v7  ;;  %342 = vmatpush1.bf16.msra.mxu1 %v978_v18  ;;  %v966_v42 = vld [vmem:[%s1322_s1 + $0x110] ss:$8 sps:$4 sm:$0xff]   ;;  %v975_v45 = vld [vmem:[%s1322_s1 + $0x124] ss:$8 sps:$4 sm:$0xff]   ;;  %v234_v47 = vshrl.u32 %v805_v40, 16  ;;  %v236_v48 = vshll.u32 %v805_v40, 16 }
  0x18   : > { %483 = vmatprep.subr.bf16.mxu0 %v948_v8  ;;  %343 = vmatprep.subr.bf16.mxu1 %v982_v21  ;;  %v229_v49 = vshll.u32 %v804_v41, 16  ;;  %v541_v50 = vrot.slane %v866_v44, 1  ;;  %v973_v53 = vld [vmem:[%s1322_s1 + $0x120] ss:$8 sps:$4 sm:$0xff]   ;;  %v981_v56 = vld [vmem:[%s1322_s1 + $0x134] ss:$8 sps:$4 sm:$0xff]  }
  0x19   : > { %v238_v52 = vrot.slane %v236_v48, 1  ;;  %v227_v58 = vshrl.u32 %v804_v41, 16  ;;  %v979_v60 = vld [vmem:[%s1322_s1 + $0x130] ss:$8 sps:$4 sm:$0xff]   ;;  %v332_v61 = vsel %vm330_vm1, %v822_v55, 0  ;;  %s784_s21 = sshll.u32 %s1339_s9, 1 }
  0x1a   : > { %v231_v59 = vrot.slane %v229_v49, 1  ;;  %v987_v62 = vld [vmem:[%s1322_s1 + $0x144] ss:$8 sps:$4 sm:$0xff]   ;;  %v985_v0 = vld [vmem:[%s1322_s1 + $0x140] ss:$8 sps:$4 sm:$0xff]   ;;  %v864_v8 = vld [vmem:[%s1322_s1 + $0x190] sm:$0xff] }
  0x1b   : > { %484 = vmatpush1.bf16.msra.mxu0 %v950_v12  ;;  %344 = vmatpush1.bf16.msra.mxu1 %v984_v23  ;;  %v239_v57 = vor.u32 %v238_v52, %v234_v47  ;;  %v993_v1 = vld [vmem:[%s1322_s1 + $0x154] ss:$8 sps:$4 sm:$0xff]   ;;  %v991_v2 = vld [vmem:[%s1322_s1 + $0x150] ss:$8 sps:$4 sm:$0xff]   ;;  %v999_v3 = vld [vmem:[%s1322_s1 + $0x164] ss:$8 sps:$4 sm:$0xff]   ;;  %v884_v10 = vcombine.high %v864_v8, %v864_v8  ;;  %v883_v11 = vcombine.low %v864_v8, %v864_v8 }
  0x1c   : > { %485 = vmatprep.subr.bf16.mxu0 %v951_v16  ;;  %345 = vmatprep.subr.bf16.mxu1 %v988_v24  ;;  %v232_v63 = vor.u32 %v231_v59, %v227_v58  ;;  %v997_v4 = vld [vmem:[%s1322_s1 + $0x160] ss:$8 sps:$4 sm:$0xff]   ;;  %v1005_v5 = vld [vmem:[%s1322_s1 + $0x174] ss:$8 sps:$4 sm:$0xff]   ;;  %v1003_v6 = vld [vmem:[%s1322_s1 + $0x170] ss:$8 sps:$4 sm:$0xff]   ;;  %v865_v12 = vcombine.low %v1221_v37, %v1218_v36 }
  0x1d   : > { %825 = vmatprep.mubr.msk.bf16.mxu1 %vm326_vm0, %v239_v57  ;;  %v1011_v7 = vld [vmem:[%s1322_s1 + $0x184] ss:$8 sps:$4 sm:$0xff]   ;;  %v1009_v9 = vld [vmem:[%s1322_s1 + $0x180] ss:$8 sps:$4 sm:$0xff]   ;;  %v632_v13 = vsel %vm330_vm1, %v883_v11, 0  ;;  %s785_s22 = sshll.u32 %s1337_s10, 3 }
  0x1e   : > { %v540_v14 = vrot.slane %v865_v12, 1  ;;  %s177_s23 = sadd.s32 %s785_s22, %s784_s21 }
  0x1f   : > { %486 = vmatpush1.bf16.msra.mxu0 %v953_v19  ;;  %346 = vmatpush1.bf16.msra.mxu1 %v990_v28  ;;  %s786_s24 = sshll.u32 %s177_s23, 3 }
  0x20   : > { %487 = vmatprep.subr.bf16.mxu0 %v954_v20  ;;  %347 = vmatprep.subr.bf16.mxu1 %v994_v29  ;;  %s179_s7 = scalar_lea.vmem %s1323_s2, %s786_s24 }
  0x23   : > { %488 = vmatpush1.bf16.msra.mxu0 %v956_v22  ;;  %348 = vmatpush1.bf16.msra.mxu1 %v996_v32 }
  0x24   : > { %489 = vmatprep.subr.bf16.mxu0 %v957_v25  ;;  %349 = vmatprep.subr.bf16.mxu1 %v1000_v33 }
  0x27   : > { %490 = vmatpush1.bf16.msra.mxu0 %v959_v26  ;;  %350 = vmatpush1.bf16.msra.mxu1 %v1002_v39 }
  0x28   : > { %846 = vmatprep.subr.msk.bf16.mxu0 %vm330_vm1, %v845_v30  ;;  %351 = vmatprep.subr.bf16.mxu1 %v1006_v43 }
  0x2b   : > { %492 = vmatpush1.bf16.msra.mxu0 %v470_v34  ;;  %352 = vmatpush1.bf16.msra.mxu1 %v1008_v51 }
  0x2c   : > { %637 = vmatprep.subr.bf16.mxu0 %v968_v35  ;;  %824 = vmatprep.subr.msk.bf16.mxu1 %vm330_vm1, %v823_v54 }
  0x2e   : > { %508 = vmatmul.mubr.bf16.vlgmr.msra.gmra.mrb[0].mxu0 %v826_v38 }
  0x2f   : > { %638 = vmatpush1.bf16.msra.mxu0 %v966_v42  ;;  %886 = vmatprep.mubr.msk.bf16.mxu0 %vm326_vm0, %v541_v50 }
  0x30   : > { %639 = vmatprep.subr.bf16.mxu0 %v975_v45  ;;  %354 = vmatpush1.bf16.msra.mxu1 %v332_v61 }
  0x33   : > { %640 = vmatpush1.bf16.msra.mxu0 %v973_v53  ;;  %370 = vmatmul.mubr.bf16.vlgmr.msra.gmra.mrb[0].mxu1 %v232_v63 }
  0x34   : > { %641 = vmatprep.subr.bf16.mxu0 %v981_v56 }
  0x37   : > { %642 = vmatpush1.bf16.msra.mxu0 %v979_v60 }
  0x38   : > { %643 = vmatprep.subr.bf16.mxu0 %v987_v62 }
  0x3b   : > { %644 = vmatpush1.bf16.msra.mxu0 %v985_v0 }
  0x3c   : > { %645 = vmatprep.subr.bf16.mxu0 %v993_v1 }
  0x3f   : > { %646 = vmatpush1.bf16.msra.mxu0 %v991_v2 }
  0x40   : > { %647 = vmatprep.subr.bf16.mxu0 %v999_v3 }
  0x43   : > { %648 = vmatpush1.bf16.msra.mxu0 %v997_v4 }
  0x44   : > { %649 = vmatprep.subr.bf16.mxu0 %v1005_v5 }
  0x47   : > { %650 = vmatpush1.bf16.msra.mxu0 %v1003_v6 }
  0x48   : > { %651 = vmatprep.subr.bf16.mxu0 %v1011_v7 }
  0x4b   : > { %652 = vmatpush1.bf16.msra.mxu0 %v1009_v9 }
  0x4c   : > { %885 = vmatprep.subr.msk.bf16.mxu0 %vm330_vm1, %v884_v10 }
  0x4f   : > { %654 = vmatpush1.bf16.msra.mxu0 %v632_v13 }
  0x52   : > { %670 = vmatmul.mubr.bf16.vlgmr.msra.gmra.mrb[0].mxu0 %v540_v14 }
 0x106   : > { %v371_v15 = vpop.f32.mrb[0].mxu1 }
 0x107   : > { %v373_v16 = vpop.f32.mrb[1].mxu1 }
 0x108   : > { %v375_v17 = vpop.f32.mrb[2].mxu1 }
 0x109   : > { %v376_v18 = vpop.f32.mrb[3].mxu1 }
 0x125   : > { %v671_v19 = vpop.f32.mrb[0].mxu0 }
 0x126   : > { %v890_v20 = vadd.f32 %v671_v19, %v371_v15  ;;  %v673_v21 = vpop.f32.mrb[1].mxu0 }
 0x127   : > { %v891_v22 = vadd.f32 %v673_v21, %v373_v16  ;;  %v675_v23 = vpop.f32.mrb[2].mxu0 }
 0x128   : > { %vm680_vm2 = vcmp.gt.f32.partialorder %v890_v20, 0.0  ;;  %v682_v24 = vmul.f32 0.1, %v890_v20  ;;  %v676_v25 = vpop.f32.mrb[3].mxu0 }
 0x129   : > { %vm681_vm3 = vcmp.gt.f32.partialorder %v891_v22, 0.0  ;;  %v683_v26 = vmul.f32 0.1, %v891_v22 }
 0x12a   : > { %v684_v27 = vsel %vm680_vm2, %v890_v20, %v682_v24 }
 0x12b   : > { %686 = vst [vmem:[%s179_s7] sm:$0xff] %v684_v27  ;;  %v685_v28 = vsel %vm681_vm3, %v891_v22, %v683_v26 }
 0x12c   : > { %687 = vst [vmem:[%s179_s7 + $0x8] sm:$0xff] %v685_v28 }
 0x12d PF: > { %s12_s13 = sadd.s32 1, %s1058_s13   ;;  %s1324_s9 = smov %s1050_s11 }
 0x12e   : > { %p9_p8 = scmp.ge.s32.totalorder %s12_s13, 10   ;;  %s1325_s10 = smov %s1054_s12 }
 0x12f   : > { %s1326_s11 = smov %s1329_s14  ;;  %s1327_s12 = smov %s1333_s15 }
 0x130   :  { %11 = sbr.rel (!%p9_p8) target bundleno = 3 (0x3), region = 60 }

</bundles_post_ra>
